<compile_context>
chip_gen: v7x
topology: tpu7x:2x2x1
jax: 0.10.0
libtpu: 0.0.40
codegen_flags: <defaults>
</compile_context>

<pallas_src>
import jax
import jax.numpy as jnp
from jax import lax
from jax.experimental import pallas as pl
from jax.experimental.pallas import tpu as pltpu

EPS = 1e-5  # nn.BatchNorm3d default


# ---------------------------------------------------------------------------
# Pass 1: per-channel sum and sum-of-squares over the (N, M) axes.
# ---------------------------------------------------------------------------
def _stats_kernel(x_ref, sum_ref, sqsum_ref):
    # x_ref:     (1, C, TM) tile of the (N, C, M_pad) slab
    # sum_ref:   (C, 1) accumulator (output block resident across the grid)
    # sqsum_ref: (C, 1) accumulator
    n = pl.program_id(0)
    m = pl.program_id(1)

    @pl.when((n == 0) & (m == 0))
    def _():
        sum_ref[...] = jnp.zeros_like(sum_ref)
        sqsum_ref[...] = jnp.zeros_like(sqsum_ref)

    x = x_ref[0].astype(jnp.float32)                        # (C, TM)
    sum_ref[...] += jnp.sum(x, axis=1, keepdims=True)       # XLU lane-reduce
    sqsum_ref[...] += jnp.sum(x * x, axis=1, keepdims=True)


# ---------------------------------------------------------------------------
# Pass 2: out = W_fold @ x + b_fold   (BN folded into the 1x1x1 conv).
# ---------------------------------------------------------------------------
def _apply_kernel(x_ref, w_ref, b_ref, o_ref):
    # x_ref: (1, C, TM); w_ref: (C, C) resident; b_ref: (C, 1) resident
    x = x_ref[0].astype(jnp.float32)                        # (C, TM)
    out = jnp.dot(w_ref[...], x, preferred_element_type=jnp.float32)
    out = out + b_ref[...]
    o_ref[0] = out.astype(o_ref.dtype)


def _round_up(x, m):
    return (x + m - 1) // m * m


def _pick_tile_m(m_total, max_tile=2048):
    """Lane-dense (multiple-of-128) M tile; prefers a divisor of M (no pad)."""
    if m_total <= max_tile:
        return _round_up(m_total, 128)
    t = max_tile - max_tile % 128
    while t >= 128:
        if m_total % t == 0:
            return t
        t -= 128
    return max_tile  # falls back to zero-padding M


def transform_3d(x_ncdhw, gamma, beta, conv_w, conv_b, *, max_tile_m=2048):
    """x_ncdhw: (N, C, D, H, W); conv_w: (Co, Ci) (squeezed 1x1x1 kernel).
    Returns (N, C, D, H, W)."""
    N, C, D, H, W = x_ncdhw.shape
    M = D * H * W
    dtype = x_ncdhw.dtype

    tm = _pick_tile_m(M, max_tile_m)
    m_pad = _round_up(M, tm)
    mt = m_pad // tm

    # Free, contiguous view of NCDHW -- no transpose, no extra HBM traffic.
    x3 = x_ncdhw.reshape(N, C, M)
    if m_pad != M:
        # Zero padding does not perturb sum / sum-of-squares; the true element
        # count is used for the mean, and padded outputs are sliced off below.
        x3 = jnp.pad(x3, ((0, 0), (0, 0), (0, m_pad - M)))

    # ---- pass 1: batch statistics ---------------------------------------
    ch_sum, ch_sqsum = pl.pallas_call(
        _stats_kernel,
        out_shape=(
            jax.ShapeDtypeStruct((C, 1), jnp.float32),
            jax.ShapeDtypeStruct((C, 1), jnp.float32),
        ),
        grid_spec=pl.GridSpec(
            grid=(N, mt),
            in_specs=[pl.BlockSpec((1, C, tm), lambda n, m: (n, 0, m))],
            out_specs=(
                pl.BlockSpec((C, 1), lambda n, m: (0, 0)),
                pl.BlockSpec((C, 1), lambda n, m: (0, 0)),
            ),
        ),
        compiler_params=pltpu.CompilerParams(
            dimension_semantics=("arbitrary", "arbitrary")),
    )(x3)

    # ---- fold BN into the conv (tiny per-channel / CxC work) -------------
    # Single-pass var = E[x^2] - mean^2, accumulated in f32; clamped >= 0.
    count = jnp.float32(N * M)
    mean = ch_sum[:, 0] / count                                    # (C,)
    var = jnp.maximum(ch_sqsum[:, 0] / count - mean * mean, 0.0)   # biased var
    inv_std = lax.rsqrt(var + EPS)
    scale = gamma.astype(jnp.float32) * inv_std                    # (C,)
    shift = beta.astype(jnp.float32) - mean * scale                # (C,)
    w_fold = conv_w.astype(jnp.float32) * scale[None, :]           # (Co, Ci)
    b_fold = conv_w.astype(jnp.float32) @ shift + conv_b.astype(jnp.float32)

    # ---- pass 2: per-tile out = W' @ x + b' -------------------------------
    out3 = pl.pallas_call(
        _apply_kernel,
        out_shape=jax.ShapeDtypeStruct((N, C, m_pad), dtype),
        grid_spec=pl.GridSpec(
            grid=(N, mt),
            in_specs=[
                pl.BlockSpec((1, C, tm), lambda n, m: (n, 0, m)),
                pl.BlockSpec((C, C), lambda n, m: (0, 0)),   # resident weight
                pl.BlockSpec((C, 1), lambda n, m: (0, 0)),   # resident bias
            ],
            out_specs=pl.BlockSpec((1, C, tm), lambda n, m: (n, 0, m)),
        ),
        compiler_params=pltpu.CompilerParams(
            dimension_semantics=("parallel", "parallel")),
    )(x3, w_fold, b_fold.reshape(C, 1))

    if m_pad != M:
        out3 = out3[:, :, :M]
    return out3.reshape(N, C, D, H, W)


def transform_3d_ref(x_ncdhw, gamma, beta, conv_w, conv_b):
    """Pure-JAX reference of the same forward pass (for correctness check)."""
    mean = jnp.mean(x_ncdhw, axis=(0, 2, 3, 4), keepdims=True)
    var = jnp.mean((x_ncdhw - mean) ** 2, axis=(0, 2, 3, 4), keepdims=True)
    xn = (x_ncdhw - mean) * lax.rsqrt(var + EPS)
    xn = xn * gamma[None, :, None, None, None] + beta[None, :, None, None, None]
    out = jnp.einsum("oc,ncdhw->nodhw", conv_w, xn)
    return out + conv_b[None, :, None, None, None]


if __name__ == "__main__":
    # Small shapes consistent with the module: latdim (channels) = 16,
    # batch = 2, 3-D spatial (D, H, W) = (8, 16, 32) -> M = 4096 (2 M-tiles).
    latdim, N, D, H, W = 16, 2, 8, 16, 32

    key = jax.random.PRNGKey(0)
    kx, kg, kbe, kw, kb = jax.random.split(key, 5)

    x = jax.random.normal(kx, (N, latdim, D, H, W), dtype=jnp.float32)

    # BatchNorm3d affine parameters (learnable; non-trivial values exercise
    # the BN->conv fold).
    gamma = jax.random.uniform(kg, (latdim,), jnp.float32, 0.5, 1.5)
    beta = jax.random.uniform(kbe, (latdim,), jnp.float32, -0.5, 0.5)

    # Conv3d(latdim, latdim, kernel_size=1) weight (Co, Ci) and bias,
    # PyTorch-like uniform(+-1/sqrt(fan_in)) init.
    bound = 1.0 / (latdim ** 0.5)
    conv_w = jax.random.uniform(kw, (latdim, latdim), jnp.float32, -bound, bound)
    conv_b = jax.random.uniform(kb, (latdim,), jnp.float32, -bound, bound)

    fwd = jax.jit(transform_3d)
    out = fwd(x, gamma, beta, conv_w, conv_b)
    out = jax.block_until_ready(out)

    ref = transform_3d_ref(x, gamma, beta, conv_w, conv_b)
    assert out.shape == (N, latdim, D, H, W)
    assert jnp.allclose(out, ref, atol=1e-4, rtol=1e-4), "mismatch vs reference"

    print("KERNEL_OK")
</pallas_src>

<mosaic_0001>
module attributes {stable_mosaic.version = 11 : i64} {
  func.func @_stats_kernel(%arg0: i32, %arg1: i32, %arg2: memref<1x16x2048xf32, #tpu.memory_space<vmem>>, %arg3: memref<16x1xf32, #tpu.memory_space<vmem>>, %arg4: memref<16x1xf32, #tpu.memory_space<vmem>>) attributes {dimension_semantics = [#tpu.dimension_semantics<arbitrary>, #tpu.dimension_semantics<arbitrary>], iteration_bounds = array<i64: 2, 2>, scalar_prefetch = 0 : i64, scratch_operands = 0 : i64, tpu.core_type = #tpu.core_type<tc>, window_params = [{transform_indices = @transform_0, window_bounds = array<i64: 1, 16, 2048>}, {pipeline_mode = #tpu.pipeline_mode<synchronous>, transform_indices = @transform_1, window_bounds = array<i64: 16, 1>}, {pipeline_mode = #tpu.pipeline_mode<synchronous>, transform_indices = @transform_2, window_bounds = array<i64: 16, 1>}]} {
    %c0_i32 = arith.constant 0 : i32
    %0 = arith.cmpi eq, %arg0, %c0_i32 : i32
    %c0_i32_0 = arith.constant 0 : i32
    %1 = arith.cmpi eq, %arg1, %c0_i32_0 : i32
    %2 = arith.andi %0, %1 : i1
    %3 = arith.extui %2 : i1 to i32
    %c0_i32_1 = arith.constant 0 : i32
    %4 = arith.cmpi ne, %3, %c0_i32_1 : i32
    scf.if %4 {
      %cst_13 = arith.constant 0.000000e+00 : f32
      %18 = vector.broadcast %cst_13 : f32 to vector<16x1xf32>
      %c0_14 = arith.constant 0 : index
      %c0_15 = arith.constant 0 : index
      %19 = vector.load %arg3[%c0_14, %c0_15] : memref<16x1xf32, #tpu.memory_space<vmem>>, vector<16x1xf32>
      tpu.vector_store %arg3[%c0_14, %c0_15], %18 {strides = array<i32>} : memref<16x1xf32, #tpu.memory_space<vmem>>, vector<16x1xf32>,
      %cst_16 = arith.constant 0.000000e+00 : f32
      %20 = vector.broadcast %cst_16 : f32 to vector<16x1xf32>
      %c0_17 = arith.constant 0 : index
      %c0_18 = arith.constant 0 : index
      %21 = vector.load %arg4[%c0_17, %c0_18] : memref<16x1xf32, #tpu.memory_space<vmem>>, vector<16x1xf32>
      tpu.vector_store %arg4[%c0_17, %c0_18], %20 {strides = array<i32>} : memref<16x1xf32, #tpu.memory_space<vmem>>, vector<16x1xf32>,
    } else {
    }
    %c0 = arith.constant 0 : index
    %c0_2 = arith.constant 0 : index
    %c0_3 = arith.constant 0 : index
    %5 = vector.load %arg2[%c0, %c0_2, %c0_3] : memref<1x16x2048xf32, #tpu.memory_space<vmem>>, vector<1x16x2048xf32>
    %6 = vector.shape_cast %5 : vector<1x16x2048xf32> to vector<16x2048xf32>
    %c0_4 = arith.constant 0 : index
    %c0_5 = arith.constant 0 : index
    %7 = vector.load %arg3[%c0_4, %c0_5] : memref<16x1xf32, #tpu.memory_space<vmem>>, vector<16x1xf32>
    %cst = arith.constant dense<0.000000e+00> : vector<16xf32>
    %8 = vector.multi_reduction <add>, %6, %cst [1] : vector<16x2048xf32> to vector<16xf32>
    %9 = vector.shape_cast %8 : vector<16xf32> to vector<16x1xf32>
    %10 = arith.addf %7, %9 : vector<16x1xf32>
    %c0_6 = arith.constant 0 : index
    %c0_7 = arith.constant 0 : index
    %11 = vector.load %arg3[%c0_6, %c0_7] : memref<16x1xf32, #tpu.memory_space<vmem>>, vector<16x1xf32>
    tpu.vector_store %arg3[%c0_6, %c0_7], %10 {strides = array<i32>} : memref<16x1xf32, #tpu.memory_space<vmem>>, vector<16x1xf32>,
    %c0_8 = arith.constant 0 : index
    %c0_9 = arith.constant 0 : index
    %12 = vector.load %arg4[%c0_8, %c0_9] : memref<16x1xf32, #tpu.memory_space<vmem>>, vector<16x1xf32>
    %13 = arith.mulf %6, %6 : vector<16x2048xf32>
    %cst_10 = arith.constant dense<0.000000e+00> : vector<16xf32>
    %14 = vector.multi_reduction <add>, %13, %cst_10 [1] : vector<16x2048xf32> to vector<16xf32>
    %15 = vector.shape_cast %14 : vector<16xf32> to vector<16x1xf32>
    %16 = arith.addf %12, %15 : vector<16x1xf32>
    %c0_11 = arith.constant 0 : index
    %c0_12 = arith.constant 0 : index
    %17 = vector.load %arg4[%c0_11, %c0_12] : memref<16x1xf32, #tpu.memory_space<vmem>>, vector<16x1xf32>
    tpu.vector_store %arg4[%c0_11, %c0_12], %16 {strides = array<i32>} : memref<16x1xf32, #tpu.memory_space<vmem>>, vector<16x1xf32>,
    return
  }
  func.func @transform_0(%arg0: i32, %arg1: i32) -> (i32, i32, i32) {
    %c0_i32 = arith.constant 0 : i32
    %c0_i32_0 = arith.constant 0 : i32
    return %arg0, %c0_i32, %arg1 : i32, i32, i32
  }
  func.func @transform_1(%arg0: i32, %arg1: i32) -> (i32, i32) {
    %c0_i32 = arith.constant 0 : i32
    %c0_i32_0 = arith.constant 0 : i32
    %c0_i32_1 = arith.constant 0 : i32
    return %c0_i32, %c0_i32_0 : i32, i32
  }
  func.func @transform_2(%arg0: i32, %arg1: i32) -> (i32, i32) {
    %c0_i32 = arith.constant 0 : i32
    %c0_i32_0 = arith.constant 0 : i32
    %c0_i32_1 = arith.constant 0 : i32
    return %c0_i32, %c0_i32_0 : i32, i32
  }
}

module attributes {stable_mosaic.version = 11 : i64} {
  func.func @_apply_kernel(%arg0: i32, %arg1: i32, %arg2: memref<1x16x2048xf32, #tpu.memory_space<vmem>>, %arg3: memref<16x16xf32, #tpu.memory_space<vmem>>, %arg4: memref<16x1xf32, #tpu.memory_space<vmem>>, %arg5: memref<1x16x2048xf32, #tpu.memory_space<vmem>>) attributes {dimension_semantics = [#tpu.dimension_semantics<parallel>, #tpu.dimension_semantics<parallel>], iteration_bounds = array<i64: 2, 2>, scalar_prefetch = 0 : i64, scratch_operands = 0 : i64, tpu.core_type = #tpu.core_type<tc>, window_params = [{transform_indices = @transform_0, window_bounds = array<i64: 1, 16, 2048>}, {pipeline_mode = #tpu.pipeline_mode<synchronous>, transform_indices = @transform_1, window_bounds = array<i64: 16, 16>}, {pipeline_mode = #tpu.pipeline_mode<synchronous>, transform_indices = @transform_2, window_bounds = array<i64: 16, 1>}, {transform_indices = @transform_3, window_bounds = array<i64: 1, 16, 2048>}]} {
    %c0 = arith.constant 0 : index
    %c0_0 = arith.constant 0 : index
    %c0_1 = arith.constant 0 : index
    %0 = vector.load %arg2[%c0, %c0_0, %c0_1] : memref<1x16x2048xf32, #tpu.memory_space<vmem>>, vector<1x16x2048xf32>
    %1 = vector.shape_cast %0 : vector<1x16x2048xf32> to vector<16x2048xf32>
    %c0_2 = arith.constant 0 : index
    %c0_3 = arith.constant 0 : index
    %2 = vector.load %arg3[%c0_2, %c0_3] : memref<16x16xf32, #tpu.memory_space<vmem>>, vector<16x16xf32>
    %cst = arith.constant dense<0.000000e+00> : vector<16x2048xf32>
    %3 = tpu.matmul %2, %1, %cst {dimension_numbers = #tpu.dot_dimension_numbers<[1], [0], [0], [1], [0, 0, 1, 1], [], []>} : vector<16x16xf32>, vector<16x2048xf32>, vector<16x2048xf32> -> vector<16x2048xf32>
    %c0_4 = arith.constant 0 : index
    %c0_5 = arith.constant 0 : index
    %4 = vector.load %arg4[%c0_4, %c0_5] : memref<16x1xf32, #tpu.memory_space<vmem>>, vector<16x1xf32>
    %5 = vector.broadcast %4 : vector<16x1xf32> to vector<16x2048xf32>
    %6 = arith.addf %3, %5 : vector<16x2048xf32>
    %c0_6 = arith.constant 0 : index
    %c0_7 = arith.constant 0 : index
    %c0_8 = arith.constant 0 : index
    %7 = vector.load %arg5[%c0_6, %c0_7, %c0_8] : memref<1x16x2048xf32, #tpu.memory_space<vmem>>, vector<1x16x2048xf32>
    %8 = vector.shape_cast %7 : vector<1x16x2048xf32> to vector<16x2048xf32>
    %9 = vector.shape_cast %6 : vector<16x2048xf32> to vector<1x16x2048xf32>
    tpu.vector_store %arg5[%c0_6, %c0_7, %c0_8], %9 {strides = array<i32>} : memref<1x16x2048xf32, #tpu.memory_space<vmem>>, vector<1x16x2048xf32>,
    return
  }
  func.func @transform_0(%arg0: i32, %arg1: i32) -> (i32, i32, i32) {
    %c0_i32 = arith.constant 0 : i32
    %c0_i32_0 = arith.constant 0 : i32
    return %arg0, %c0_i32, %arg1 : i32, i32, i32
  }
  func.func @transform_1(%arg0: i32, %arg1: i32) -> (i32, i32) {
    %c0_i32 = arith.constant 0 : i32
    %c0_i32_0 = arith.constant 0 : i32
    %c0_i32_1 = arith.constant 0 : i32
    return %c0_i32, %c0_i32_0 : i32, i32
  }
  func.func @transform_2(%arg0: i32, %arg1: i32) -> (i32, i32) {
    %c0_i32 = arith.constant 0 : i32
    %c0_i32_0 = arith.constant 0 : i32
    %c0_i32_1 = arith.constant 0 : i32
    return %c0_i32, %c0_i32_0 : i32, i32
  }
  func.func @transform_3(%arg0: i32, %arg1: i32) -> (i32, i32, i32) {
    %c0_i32 = arith.constant 0 : i32
    %c0_i32_0 = arith.constant 0 : i32
    return %arg0, %c0_i32, %arg1 : i32, i32, i32
  }
}

</mosaic_0001>

<bundles_post_ra>
// kernel: transform_3d.2
= control target key start
LH: loop header
LB: loop body
LE: loop exit
PB: predicated region body
PF: predicated region fallthrough
CT: control target
= control target key end

     0   :  { %s576_s9 = smov 0   ;;  %s578_s10 = smov 0   ;;  %s800_s0 = inlined_call_operand.vmem [shape: f32[2,16,4096], index: 0, kind: input, shape index: {}]   ;;  %s801_s1 = inlined_call_operand.vmem [shape: f32[16,1], index: 1, kind: output, shape index: {0}]   ;;  %s802_s2 = inlined_call_operand.vmem [shape: f32[16,1], index: 2, kind: output, shape index: {1}]  }
   0x1   :  { %s580_s11 = smov 0   ;;  %s582_s12 = smov 0  }
   0x2   :  { %s584_s13 = smov 0   ;;  %s586_s14 = smov 0  }
   0x3   :  { %s588_s15 = smov 0  }
   0x4 LB: > { %s22_s16 = sadd.s32 1, %s550_s13  ;;  %s25_s17 = sadd.s32 1, %s554_s14  ;;  %s558_s15 = sphi %s588_s15, %s13_s15   ;;  %s554_s14 = sphi %s586_s14, %s808_s14   ;;  %s550_s13 = sphi %s584_s13, %s807_s13   ;;  %s546_s12 = sphi %s582_s12, %s806_s12   ;;  %s542_s11 = sphi %s580_s11, %s805_s11   ;;  %s538_s10 = sphi %s578_s10, %s804_s10   ;;  %s534_s9 = sphi %s576_s9, %s803_s9  }
   0x5   : > { %p23_p0 = scmp.ge.s32.totalorder %s22_s16, 2  ;;  %p41_p1 = scmp.ne.s32.totalorder %s538_s10, %s534_s9 }
   0x6   : > { %p42_p2 = scmp.eq.s32.totalorder %s558_s15, 0  ;;  %s34_s21 = sadd.s32 1, %s538_s10 }
   0x7   : > { %s810_s16 = smov (%p23_p0, %s22_s16), 0  ;;  %s812_s17 = smov (!%p23_p0, %s25_s17), %s554_s14 }
   0x8   : > { %p43_p3 = por %p42_p2, %p41_p1  ;;  %p27_p4 = scmp.ge.s32.totalorder %s812_s17, 2 }
   0x9   : > { %s30_s18 = ssub.s32 %s550_s13, %s810_s16  ;;  %p438_p6 = scmp.ge.s32.totalorder %s558_s15, 4 }
   0xa   : > { %s814_s17 = smov (%p27_p4, %s812_s17), 0 }
   0xb   : > { %s29_s19 = ssub.s32 %s554_s14, %s814_s17  ;;  %109 = sbr.rel (%p438_p6) target bundleno = 41 (0x29), region = 16 }
   0xc   : > { %s31_s20 = sor.u32 %s30_s18, %s29_s19 }
   0xd   : > { %p32_p5 = scmp.eq.s32.totalorder %s31_s20, 0 }
   0xf   : > { %s627_s22 = scalar_select %p32_p5, %s538_s10, %s34_s21  }
  0x12   : > { %112 = sbr.rel (!%p43_p3) target bundleno = 41 (0x29), region = 20  ;;  %s114_s23 = sand.u32 (%p43_p3), 1, %s538_s10  }
  0x13   : > { %s440_s24 = sshll.u32 (%p43_p3), %s550_s13, 4  ;;  %s439_s25 = sshll.u32 (%p43_p3), %s114_s23, 8 }
  0x14   : > { %s441_s26 = sshll.u32 (%p43_p3), %s554_s14, 6  ;;  %s641_s4 = scalar_lea.vmem (%p43_p3), [#allocation2], %s439_s25 }
  0x15   : > { %s119_s27 = sadd.s32 (%p43_p3), %s441_s26, %s440_s24 }
  0x16   : > { %s442_s28 = sshll.u32 (%p43_p3), %s119_s27, 3 }
  0x17   : > { %s636_s3 = scalar_lea.vmem (%p43_p3), %s800_s0, %s442_s28 }
  0x18   : > { %v134_v0 = vld [vmem:[%s636_s3] sm:$0xff] (%p43_p3)  ;;  %v136_v1 = vld [vmem:[%s636_s3 + $0x8] sm:$0xff] (%p43_p3)  ;;  %v138_v2 = vld [vmem:[%s636_s3 + $0x10] sm:$0xff] (%p43_p3) }
  0x19   : > { %135 = vst [vmem:[%s641_s4] sm:$0xff] %v134_v0  ;;  %137 = vst [vmem:[%s641_s4 + $0x8] sm:$0xff] %v136_v1  ;;  %v140_v3 = vld [vmem:[%s636_s3 + $0x18] sm:$0xff]  ;;  %v142_v4 = vld [vmem:[%s636_s3 + $0x20] sm:$0xff] }
  0x1a   : > { %139 = vst [vmem:[%s641_s4 + $0x10] sm:$0xff] %v138_v2  ;;  %v144_v5 = vld [vmem:[%s636_s3 + $0x28] sm:$0xff]  ;;  %141 = vst [vmem:[%s641_s4 + $0x18] sm:$0xff] %v140_v3  ;;  %v146_v6 = vld [vmem:[%s636_s3 + $0x30] sm:$0xff] }
  0x1b   : > { %143 = vst [vmem:[%s641_s4 + $0x20] sm:$0xff] %v142_v4  ;;  %145 = vst [vmem:[%s641_s4 + $0x28] sm:$0xff] %v144_v5  ;;  %v148_v7 = vld [vmem:[%s636_s3 + $0x38] sm:$0xff]  ;;  %v150_v8 = vld [vmem:[%s636_s3 + $0x40] sm:$0xff] }
  0x1c   : > { %147 = vst [vmem:[%s641_s4 + $0x30] sm:$0xff] %v146_v6  ;;  %149 = vst [vmem:[%s641_s4 + $0x38] sm:$0xff] %v148_v7  ;;  %v152_v9 = vld [vmem:[%s636_s3 + $0x48] sm:$0xff]  ;;  %v154_v10 = vld [vmem:[%s636_s3 + $0x50] sm:$0xff] }
  0x1d   : > { %151 = vst [vmem:[%s641_s4 + $0x40] sm:$0xff] %v150_v8  ;;  %v156_v11 = vld [vmem:[%s636_s3 + $0x58] sm:$0xff]  ;;  %153 = vst [vmem:[%s641_s4 + $0x48] sm:$0xff] %v152_v9  ;;  %v158_v12 = vld [vmem:[%s636_s3 + $0x60] sm:$0xff] }
  0x1e   : > { %155 = vst [vmem:[%s641_s4 + $0x50] sm:$0xff] %v154_v10  ;;  %157 = vst [vmem:[%s641_s4 + $0x58] sm:$0xff] %v156_v11  ;;  %v160_v13 = vld [vmem:[%s636_s3 + $0x68] sm:$0xff]  ;;  %v162_v14 = vld [vmem:[%s636_s3 + $0x70] sm:$0xff] }
  0x1f   : > { %159 = vst [vmem:[%s641_s4 + $0x60] sm:$0xff] %v158_v12  ;;  %161 = vst [vmem:[%s641_s4 + $0x68] sm:$0xff] %v160_v13  ;;  %v164_v15 = vld [vmem:[%s636_s3 + $0x78] sm:$0xff]  ;;  %v166_v16 = vld [vmem:[%s636_s3 + $0x100] sm:$0xff] }
  0x20   : > { %163 = vst [vmem:[%s641_s4 + $0x70] sm:$0xff] %v162_v14  ;;  %v168_v17 = vld [vmem:[%s636_s3 + $0x108] sm:$0xff]  ;;  %165 = vst [vmem:[%s641_s4 + $0x78] sm:$0xff] %v164_v15  ;;  %v170_v18 = vld [vmem:[%s636_s3 + $0x110] sm:$0xff] }
  0x21   : > { %167 = vst [vmem:[%s641_s4 + $0x80] sm:$0xff] %v166_v16  ;;  %169 = vst [vmem:[%s641_s4 + $0x88] sm:$0xff] %v168_v17  ;;  %v172_v19 = vld [vmem:[%s636_s3 + $0x118] sm:$0xff]  ;;  %v174_v20 = vld [vmem:[%s636_s3 + $0x120] sm:$0xff] }
  0x22   : > { %171 = vst [vmem:[%s641_s4 + $0x90] sm:$0xff] %v170_v18  ;;  %173 = vst [vmem:[%s641_s4 + $0x98] sm:$0xff] %v172_v19  ;;  %v176_v21 = vld [vmem:[%s636_s3 + $0x128] sm:$0xff]  ;;  %v178_v22 = vld [vmem:[%s636_s3 + $0x130] sm:$0xff] }
  0x23   : > { %175 = vst [vmem:[%s641_s4 + $0xa0] sm:$0xff] %v174_v20  ;;  %v180_v23 = vld [vmem:[%s636_s3 + $0x138] sm:$0xff]  ;;  %177 = vst [vmem:[%s641_s4 + $0xa8] sm:$0xff] %v176_v21  ;;  %v182_v24 = vld [vmem:[%s636_s3 + $0x140] sm:$0xff] }
  0x24   : > { %179 = vst [vmem:[%s641_s4 + $0xb0] sm:$0xff] %v178_v22  ;;  %181 = vst [vmem:[%s641_s4 + $0xb8] sm:$0xff] %v180_v23  ;;  %v184_v25 = vld [vmem:[%s636_s3 + $0x148] sm:$0xff]  ;;  %v186_v26 = vld [vmem:[%s636_s3 + $0x150] sm:$0xff] }
  0x25   : > { %183 = vst [vmem:[%s641_s4 + $0xc0] sm:$0xff] %v182_v24  ;;  %185 = vst [vmem:[%s641_s4 + $0xc8] sm:$0xff] %v184_v25  ;;  %v188_v27 = vld [vmem:[%s636_s3 + $0x158] sm:$0xff]  ;;  %v190_v28 = vld [vmem:[%s636_s3 + $0x160] sm:$0xff] }
  0x26   : > { %187 = vst [vmem:[%s641_s4 + $0xd0] sm:$0xff] %v186_v26  ;;  %v192_v29 = vld [vmem:[%s636_s3 + $0x168] sm:$0xff]  ;;  %189 = vst [vmem:[%s641_s4 + $0xd8] sm:$0xff] %v188_v27  ;;  %v194_v30 = vld [vmem:[%s636_s3 + $0x170] sm:$0xff] }
  0x27   : > { %191 = vst [vmem:[%s641_s4 + $0xe0] sm:$0xff] %v190_v28  ;;  %193 = vst [vmem:[%s641_s4 + $0xe8] sm:$0xff] %v192_v29  ;;  %v196_v31 = vld [vmem:[%s636_s3 + $0x178] sm:$0xff] }
  0x28   : > { %195 = vst [vmem:[%s641_s4 + $0xf0] sm:$0xff] %v194_v30  ;;  %197 = vst [vmem:[%s641_s4 + $0xf8] sm:$0xff] %v196_v31 }
  0x29 PF: > { %p443_p7 = scmp.ge.s32.totalorder %s558_s15, 1  ;;  %p202_p8 = scmp.lt.s32.totalorder %s558_s15, 5 }
  0x2b   : > { %p203_p9 = pnand %p443_p7, %p202_p8 }
  0x2c   : > { %s209_s5 = sand.u32 (!%p203_p9), 1, %s534_s9   ;;  %p226_p10 = scmp.eq.s32.totalorder (!%p203_p9), %s546_s12, 0 }
  0x2d   : > { %206 = sbr.rel (%p203_p9) target bundleno = 241 (0xf1), region = 43  ;;  %s444_s6 = sshll.u32 (!%p203_p9), %s209_s5, 8 }
  0x2e   : > { %p227_p11 = scmp.eq.s32.totalorder (!%p203_p9), %s542_s11, 0  ;;  %s709_s7 = scalar_lea.vmem (!%p203_p9), [#allocation2], %s444_s6 }
  0x30   : > { %p228_p12 = pnand (!%p203_p9), %p227_p11, %p226_p10 }
  0x34   : > { %231 = sbr.rel (%p228_p12) target bundleno = 59 (0x3b), region = 51  ;;  %vm232_vm0 = vcmask (!%p228_p12), 7168   ;;  %v560_v32 = vmov (!%p228_p12), 0.0  }
  0x35   : > { %233 = vst.msk [vmem:[%s801_s1] sm:$0xff] (!%p228_p12), %vm232_vm0, %v560_v32  ;;  %234 = vst.msk [vmem:[%s801_s1 + $0x8] sm:$0xff] (!%p228_p12), %vm232_vm0, %v560_v32 }
  0x36   : > { %235 = vst.msk [vmem:[%s802_s2] sm:$0xff] (!%p228_p12), %vm232_vm0, %v560_v32  ;;  %236 = vst.msk [vmem:[%s802_s2 + $0x8] sm:$0xff] (!%p228_p12), %vm232_vm0, %v560_v32 }
  0x3b PF: > { %v237_v33 = vld [vmem:[%s709_s7] sm:$0xff]  ;;  %v238_v34 = vld [vmem:[%s709_s7 + $0x8] sm:$0xff]  ;;  %v239_v35 = vld [vmem:[%s709_s7 + $0x10] sm:$0xff]  ;;  %vm307_vm1 = vcmask 7168  }
  0x3c   : > { %v240_v36 = vld [vmem:[%s709_s7 + $0x18] sm:$0xff]  ;;  %v312_v37 = vmul.f32 %v237_v33, %v237_v33  ;;  %v313_v38 = vmul.f32 %v238_v34, %v238_v34  ;;  %v314_v39 = vmul.f32 %v239_v35, %v239_v35  ;;  %v271_v40 = vadd.f32 %v238_v34, %v237_v33  ;;  %v241_v41 = vld [vmem:[%s709_s7 + $0x20] sm:$0xff]  ;;  %v242_v44 = vld [vmem:[%s709_s7 + $0x28] sm:$0xff] }
  0x3d   : > { %v315_v42 = vmul.f32 %v240_v36, %v240_v36  ;;  %v316_v46 = vmul.f32 %v241_v41, %v241_v41  ;;  %v253_v48 = vld [vmem:[%s709_s7 + $0x80] sm:$0xff]  ;;  %v254_v49 = vld [vmem:[%s709_s7 + $0x88] sm:$0xff]  ;;  %v243_v50 = vld [vmem:[%s709_s7 + $0x30] sm:$0xff]  ;;  %v317_v53 = vmul.f32 %v242_v44, %v242_v44 }
  0x3e   : > { %v344_v43 = vadd.f32 %v313_v38, %v312_v37  ;;  %v272_v45 = vadd.f32 %v271_v40, %v239_v35  ;;  %v255_v52 = vld [vmem:[%s709_s7 + $0x90] sm:$0xff]  ;;  %v328_v55 = vmul.f32 %v253_v48, %v253_v48  ;;  %v329_v56 = vmul.f32 %v254_v49, %v254_v49  ;;  %v244_v57 = vld [vmem:[%s709_s7 + $0x38] sm:$0xff]  ;;  %v245_v63 = vld [vmem:[%s709_s7 + $0x40] sm:$0xff] }
  0x3f   : > { %v256_v59 = vld [vmem:[%s709_s7 + $0x98] sm:$0xff]  ;;  %v318_v60 = vmul.f32 %v243_v50, %v243_v50  ;;  %v330_v62 = vmul.f32 %v255_v52, %v255_v52  ;;  %v257_v1 = vld [vmem:[%s709_s7 + $0xa0] sm:$0xff]  ;;  %v319_v2 = vmul.f32 %v244_v57, %v244_v57  ;;  %v246_v6 = vld [vmem:[%s709_s7 + $0x48] sm:$0xff]  ;;  %v288_v9 = vadd.f32 %v254_v49, %v253_v48 }
  0x40   : > { %v345_v47 = vadd.f32 %v344_v43, %v314_v39  ;;  %v273_v51 = vadd.f32 %v272_v45, %v240_v36  ;;  %v331_v4 = vmul.f32 %v256_v59, %v256_v59  ;;  %v361_v5 = vadd.f32 %v329_v56, %v328_v55  ;;  %v258_v8 = vld [vmem:[%s709_s7 + $0xa8] sm:$0xff]  ;;  %v247_v14 = vld [vmem:[%s709_s7 + $0x50] sm:$0xff]  ;;  %v248_v22 = vld [vmem:[%s709_s7 + $0x58] sm:$0xff] }
  0x41   : > { %v320_v10 = vmul.f32 %v245_v63, %v245_v63  ;;  %v332_v12 = vmul.f32 %v257_v1, %v257_v1  ;;  %v259_v16 = vld [vmem:[%s709_s7 + $0xb0] sm:$0xff]  ;;  %v289_v17 = vadd.f32 %v288_v9, %v255_v52  ;;  %v321_v18 = vmul.f32 %v246_v6, %v246_v6  ;;  %v260_v24 = vld [vmem:[%s709_s7 + $0xb8] sm:$0xff]  ;;  %v249_v30 = vld [vmem:[%s709_s7 + $0x60] sm:$0xff] }
  0x42   : > { %v346_v54 = vadd.f32 %v345_v47, %v315_v42  ;;  %v274_v58 = vadd.f32 %v273_v51, %v241_v41  ;;  %v362_v13 = vadd.f32 %v361_v5, %v330_v62  ;;  %v333_v20 = vmul.f32 %v258_v8, %v258_v8  ;;  %v261_v32 = vld [vmem:[%s709_s7 + $0xc0] sm:$0xff]  ;;  %v250_v38 = vld [vmem:[%s709_s7 + $0x68] sm:$0xff]  ;;  %v263_v48 = vld [vmem:[%s709_s7 + $0xd0] sm:$0xff] }
  0x43   : > { %v290_v25 = vadd.f32 %v289_v17, %v256_v59  ;;  %v322_v26 = vmul.f32 %v247_v14, %v247_v14  ;;  %v334_v28 = vmul.f32 %v259_v16, %v259_v16  ;;  %v323_v34 = vmul.f32 %v248_v22, %v248_v22  ;;  %v262_v40 = vld [vmem:[%s709_s7 + $0xc8] sm:$0xff]  ;;  %v264_v56 = vld [vmem:[%s709_s7 + $0xd8] sm:$0xff] }
  0x44   : > { %v347_v61 = vadd.f32 %v346_v54, %v316_v46  ;;  %v275_v0 = vadd.f32 %v274_v58, %v242_v44  ;;  %v363_v21 = vadd.f32 %v362_v13, %v331_v4  ;;  %v335_v36 = vmul.f32 %v260_v24, %v260_v24  ;;  %v251_v46 = vld [vmem:[%s709_s7 + $0x70] sm:$0xff]  ;;  %v252_v54 = vld [vmem:[%s709_s7 + $0x78] sm:$0xff] }
  0x45   : > { %v291_v33 = vadd.f32 %v290_v25, %v257_v1  ;;  %v324_v42 = vmul.f32 %v249_v30, %v249_v30  ;;  %v336_v44 = vmul.f32 %v261_v32, %v261_v32  ;;  %v337_v52 = vmul.f32 %v262_v40, %v262_v40  ;;  %v268_v17 = vld [vmem:[%s709_s7 + $0xf8] sm:$0xff] }
  0x46   : > { %v348_v3 = vadd.f32 %v347_v61, %v317_v53  ;;  %v276_v7 = vadd.f32 %v275_v0, %v243_v50  ;;  %v364_v29 = vadd.f32 %v363_v21, %v332_v12  ;;  %v325_v50 = vmul.f32 %v250_v38, %v250_v38  ;;  %v267_v12 = vld [vmem:[%s709_s7 + $0xf0] sm:$0xff] }
  0x47   : > { %v292_v41 = vadd.f32 %v291_v33, %v258_v8  ;;  %v326_v58 = vmul.f32 %v251_v46, %v251_v46  ;;  %v327_v1 = vmul.f32 %v252_v54, %v252_v54 }
  0x48   : > { %v349_v11 = vadd.f32 %v348_v3, %v318_v60  ;;  %v277_v15 = vadd.f32 %v276_v7, %v244_v57  ;;  %v365_v37 = vadd.f32 %v364_v29, %v333_v20  ;;  %v338_v60 = vmul.f32 %v263_v48, %v263_v48  ;;  %v269_v29 = vld [vmem:[%s801_s1] sm:$0xff] }
  0x49   : > { %v293_v49 = vadd.f32 %v292_v41, %v259_v16  ;;  %v339_v3 = vmul.f32 %v264_v56, %v264_v56 }
  0x4a   : > { %v350_v19 = vadd.f32 %v349_v11, %v319_v2  ;;  %v278_v23 = vadd.f32 %v277_v15, %v245_v63  ;;  %v366_v45 = vadd.f32 %v365_v37, %v334_v28  ;;  %v265_v63 = vld [vmem:[%s709_s7 + $0xe0] sm:$0xff] }
  0x4b   : > { %v294_v57 = vadd.f32 %v293_v49, %v260_v24  ;;  %v340_v9 = vmul.f32 %v265_v63, %v265_v63 }
  0x4c   : > { %v351_v27 = vadd.f32 %v350_v19, %v320_v10  ;;  %v279_v31 = vadd.f32 %v278_v23, %v246_v6  ;;  %v367_v53 = vadd.f32 %v366_v45, %v335_v36  ;;  %v266_v6 = vld [vmem:[%s709_s7 + $0xe8] sm:$0xff]  ;;  %v342_v19 = vmul.f32 %v267_v12, %v267_v12 }
  0x4d   : > { %v295_v0 = vadd.f32 %v294_v57, %v261_v32  ;;  %v341_v15 = vmul.f32 %v266_v6, %v266_v6  ;;  %v270_v36 = vld [vmem:[%s801_s1 + $0x8] sm:$0xff] }
  0x4e   : > { %v352_v35 = vadd.f32 %v351_v27, %v321_v18  ;;  %v280_v39 = vadd.f32 %v279_v31, %v247_v14  ;;  %v368_v61 = vadd.f32 %v367_v53, %v336_v44 }
  0x4f   : > { %v296_v7 = vadd.f32 %v295_v0, %v262_v40 }
  0x50   : > { %v353_v43 = vadd.f32 %v352_v35, %v322_v26  ;;  %v281_v47 = vadd.f32 %v280_v39, %v248_v22  ;;  %v369_v4 = vadd.f32 %v368_v61, %v337_v52  ;;  %v343_v22 = vmul.f32 %v268_v17, %v268_v17  ;;  %v311_v35 = vld [vmem:[%s802_s2 + $0x8] sm:$0xff] }
  0x51   : > { %v297_v13 = vadd.f32 %v296_v7, %v263_v48 }
  0x52   : > { %v354_v51 = vadd.f32 %v353_v43, %v323_v34  ;;  %v282_v55 = vadd.f32 %v281_v47, %v249_v30  ;;  %v370_v10 = vadd.f32 %v369_v4, %v338_v60  ;;  %v310_v30 = vld [vmem:[%s802_s2] sm:$0xff] }
  0x53   : > { %v298_v18 = vadd.f32 %v297_v13, %v264_v56 }
  0x54   : > { %v355_v59 = vadd.f32 %v354_v51, %v324_v42  ;;  %v283_v62 = vadd.f32 %v282_v55, %v250_v38  ;;  %v371_v16 = vadd.f32 %v370_v10, %v339_v3 }
  0x55   : > { %v299_v21 = vadd.f32 %v298_v18, %v265_v63 }
  0x56   : > { %v356_v2 = vadd.f32 %v355_v59, %v325_v50  ;;  %v284_v5 = vadd.f32 %v283_v62, %v251_v46  ;;  %v372_v20 = vadd.f32 %v371_v16, %v340_v9 }
  0x57   : > { %v300_v24 = vadd.f32 %v299_v21, %v266_v6 }
  0x58   : > { %v357_v8 = vadd.f32 %v356_v2, %v326_v58  ;;  %v285_v11 = vadd.f32 %v284_v5, %v252_v54  ;;  %v373_v23 = vadd.f32 %v372_v20, %v341_v15 }
  0x59   : > { %v301_v26 = vadd.f32 %v300_v24, %v267_v12 }
  0x5a   : > { %v358_v14 = vadd.f32 %v357_v8, %v327_v1  ;;  %286 = vadd.xlane.f32.xlu0 %v285_v11  ;;  %v374_v25 = vadd.f32 %v373_v23, %v342_v19 }
  0x5b   : > { %v302_v28 = vadd.f32 %v301_v26, %v268_v17 }
  0x5c   : > { %359 = vadd.xlane.f32.xlu1 %v358_v14  ;;  %v375_v27 = vadd.f32 %v374_v25, %v343_v22 }
  0x5e   : > { %303 = vadd.xlane.f32.xlu0 %v302_v28 }
  0x60   : > { %376 = vadd.xlane.f32.xlu1 %v375_v27 }
  0xe7   : > { %v287_v31 = vpop.xlane.xlu0 %286 }
  0xe8   : > { %v305_v33 = vadd.f32 %v287_v31, %v269_v29 }
  0xe9   : > { %v360_v32 = vpop.xlane.xlu1 %359 }
  0xea   : > { %v378_v34 = vadd.f32 %v360_v32, %v310_v30  ;;  %308 = vst.msk [vmem:[%s801_s1] sm:$0xff] %vm307_vm1, %v305_v33 }
  0xeb   : > { %v304_v39 = vpop.xlane.xlu0 %303 }
  0xec   : > { %380 = vst.msk [vmem:[%s802_s2] sm:$0xff] %vm307_vm1, %v378_v34  ;;  %v306_v40 = vadd.f32 %v304_v39, %v270_v36 }
  0xed   : > { %v377_v37 = vpop.xlane.xlu1 %376 }
  0xee   : > { %v379_v38 = vadd.f32 %v377_v37, %v311_v35  ;;  %309 = vst.msk [vmem:[%s801_s1 + $0x8] sm:$0xff] %vm307_vm1, %v306_v40 }
  0xf0   : > { %381 = vst.msk [vmem:[%s802_s2 + $0x8] sm:$0xff] %vm307_vm1, %v379_v38 }
  0xf1 PF: > { %s13_s15 = sadd.s32 1, %s558_s15   ;;  %s803_s9 = smov %s538_s10 }
  0xf2   : > { %p10_p13 = scmp.ge.s32.totalorder %s13_s15, 6   ;;  %s804_s10 = smov %s627_s22 }
  0xf3   : > { %s805_s11 = smov %s550_s13  ;;  %s806_s12 = smov %s554_s14 }
  0xf4   : > { %s807_s13 = smov %s810_s16  ;;  %s808_s14 = smov %s814_s17 }
  0xf5   :  { %12 = sbr.rel (!%p10_p13) target bundleno = 4 (0x4), region = 90 }

// kernel: transform_3d.3
= control target key start
LH: loop header
LB: loop body
LE: loop exit
PB: predicated region body
PF: predicated region fallthrough
CT: control target
= control target key end

     0   :  { %s1335_s12 = smov 0   ;;  %s1337_s13 = smov 0   ;;  %s1727_s0 = inlined_call_operand.vmem [shape: f32[2,16,4096], index: 0, kind: input, shape index: {}]   ;;  %s1728_s1 = inlined_call_operand.vmem [shape: f32[16,16], index: 1, kind: input, shape index: {}]   ;;  %s1729_s2 = inlined_call_operand.vmem [shape: f32[16,1], index: 2, kind: input, shape index: {}]   ;;  %s1730_s3 = inlined_call_operand.vmem [shape: f32[2,16,4096], index: 3, kind: output, shape index: {}]  }
   0x1   :  { %s1339_s14 = smov 0   ;;  %s1341_s15 = smov 0  }
   0x2   :  { %s1343_s16 = smov 0   ;;  %s1345_s17 = smov 0  }
   0x3   :  { %s1347_s18 = smov 0  }
   0x4 LB: > { %s22_s19 = sadd.s32 1, %s1303_s16  ;;  %s25_s20 = sadd.s32 1, %s1307_s17  ;;  %s1311_s18 = sphi %s1347_s18, %s13_s18   ;;  %s1307_s17 = sphi %s1345_s17, %s1737_s17   ;;  %s1303_s16 = sphi %s1343_s16, %s1736_s16   ;;  %s1299_s15 = sphi %s1341_s15, %s1735_s15   ;;  %s1295_s14 = sphi %s1339_s14, %s1734_s14   ;;  %s1291_s13 = sphi %s1337_s13, %s1733_s13   ;;  %s1287_s12 = sphi %s1335_s12, %s1732_s12  }
   0x5   : > { %p23_p0 = scmp.ge.s32.totalorder %s22_s19, 2  ;;  %s1133_s21 = sadd.s32 4294967295, %s1311_s18  }
   0x6   : > { %p41_p1 = scmp.ne.s32.totalorder %s1291_s13, %s1287_s12  ;;  %p42_p2 = scmp.eq.s32.totalorder %s1311_s18, 0 }
   0x7   : > { %s1739_s19 = smov (%p23_p0, %s22_s19), 0  ;;  %s1741_s20 = smov (!%p23_p0, %s25_s20), %s1307_s17 }
   0x8   : > { %p27_p3 = scmp.ge.s32.totalorder %s1741_s20, 2  ;;  %p115_p4 = scmp.eq.s32.totalorder %s1133_s21, 3 }
   0x9   : > { %s30_s22 = ssub.s32 %s1303_s16, %s1739_s19  ;;  %p43_p5 = por %p42_p2, %p41_p1 }
   0xa   : > { %s1743_s20 = smov (%p27_p3, %s1741_s20), 0  ;;  %p1383_p6 = por %p115_p4, %p41_p1 }
   0xb   : > { %s29_s24 = ssub.s32 %s1307_s17, %s1743_s20  ;;  %s34_s26 = sadd.s32 1, %s1291_s13 }
   0xc   : > { %s31_s25 = sor.u32 %s30_s22, %s29_s24  ;;  %p1136_p8 = scmp.ge.s32.totalorder %s1311_s18, 4 }
   0xd   : > { %p32_p7 = scmp.eq.s32.totalorder %s31_s25, 0 }
   0xe   : > { %143 = sbr.rel (%p1136_p8) target bundleno = 44 (0x2c), region = 24 }
   0xf   : > { %s1391_s27 = scalar_select %p32_p7, %s1291_s13, %s34_s26  }
  0x15   : > { %146 = sbr.rel (!%p43_p5) target bundleno = 44 (0x2c), region = 28  ;;  %s148_s28 = sand.u32 (%p43_p5), 1, %s1291_s13  }
  0x16   : > { %s1138_s29 = sshll.u32 (%p43_p5), %s1303_s16, 4  ;;  %s1137_s30 = sshll.u32 (%p43_p5), %s148_s28, 8 }
  0x17   : > { %s1139_s4 = sshll.u32 (%p43_p5), %s1307_s17, 6  ;;  %s1405_s10 = scalar_lea.vmem (%p43_p5), [#allocation2], %s1137_s30 }
  0x18   : > { %s153_s5 = sadd.s32 (%p43_p5), %s1139_s4, %s1138_s29 }
  0x19   : > { %s1140_s6 = sshll.u32 (%p43_p5), %s153_s5, 3 }
  0x1a   : > { %s1400_s9 = scalar_lea.vmem (%p43_p5), %s1727_s0, %s1140_s6 }
  0x1b   : > { %v168_v0 = vld [vmem:[%s1400_s9] sm:$0xff] (%p43_p5)  ;;  %v170_v1 = vld [vmem:[%s1400_s9 + $0x8] sm:$0xff] (%p43_p5)  ;;  %v172_v2 = vld [vmem:[%s1400_s9 + $0x10] sm:$0xff] (%p43_p5) }
  0x1c   : > { %169 = vst [vmem:[%s1405_s10] sm:$0xff] %v168_v0  ;;  %171 = vst [vmem:[%s1405_s10 + $0x8] sm:$0xff] %v170_v1  ;;  %v174_v3 = vld [vmem:[%s1400_s9 + $0x18] sm:$0xff]  ;;  %v176_v4 = vld [vmem:[%s1400_s9 + $0x20] sm:$0xff] }
  0x1d   : > { %173 = vst [vmem:[%s1405_s10 + $0x10] sm:$0xff] %v172_v2  ;;  %v178_v5 = vld [vmem:[%s1400_s9 + $0x28] sm:$0xff]  ;;  %175 = vst [vmem:[%s1405_s10 + $0x18] sm:$0xff] %v174_v3  ;;  %v180_v6 = vld [vmem:[%s1400_s9 + $0x30] sm:$0xff] }
  0x1e   : > { %177 = vst [vmem:[%s1405_s10 + $0x20] sm:$0xff] %v176_v4  ;;  %179 = vst [vmem:[%s1405_s10 + $0x28] sm:$0xff] %v178_v5  ;;  %v182_v7 = vld [vmem:[%s1400_s9 + $0x38] sm:$0xff]  ;;  %v184_v8 = vld [vmem:[%s1400_s9 + $0x40] sm:$0xff] }
  0x1f   : > { %181 = vst [vmem:[%s1405_s10 + $0x30] sm:$0xff] %v180_v6  ;;  %183 = vst [vmem:[%s1405_s10 + $0x38] sm:$0xff] %v182_v7  ;;  %v186_v9 = vld [vmem:[%s1400_s9 + $0x48] sm:$0xff]  ;;  %v188_v10 = vld [vmem:[%s1400_s9 + $0x50] sm:$0xff] }
  0x20   : > { %185 = vst [vmem:[%s1405_s10 + $0x40] sm:$0xff] %v184_v8  ;;  %v190_v11 = vld [vmem:[%s1400_s9 + $0x58] sm:$0xff]  ;;  %187 = vst [vmem:[%s1405_s10 + $0x48] sm:$0xff] %v186_v9  ;;  %v192_v12 = vld [vmem:[%s1400_s9 + $0x60] sm:$0xff] }
  0x21   : > { %189 = vst [vmem:[%s1405_s10 + $0x50] sm:$0xff] %v188_v10  ;;  %191 = vst [vmem:[%s1405_s10 + $0x58] sm:$0xff] %v190_v11  ;;  %v194_v13 = vld [vmem:[%s1400_s9 + $0x68] sm:$0xff]  ;;  %v196_v14 = vld [vmem:[%s1400_s9 + $0x70] sm:$0xff] }
  0x22   : > { %193 = vst [vmem:[%s1405_s10 + $0x60] sm:$0xff] %v192_v12  ;;  %195 = vst [vmem:[%s1405_s10 + $0x68] sm:$0xff] %v194_v13  ;;  %v198_v15 = vld [vmem:[%s1400_s9 + $0x78] sm:$0xff]  ;;  %v200_v16 = vld [vmem:[%s1400_s9 + $0x100] sm:$0xff] }
  0x23   : > { %197 = vst [vmem:[%s1405_s10 + $0x70] sm:$0xff] %v196_v14  ;;  %v202_v17 = vld [vmem:[%s1400_s9 + $0x108] sm:$0xff]  ;;  %199 = vst [vmem:[%s1405_s10 + $0x78] sm:$0xff] %v198_v15  ;;  %v204_v18 = vld [vmem:[%s1400_s9 + $0x110] sm:$0xff] }
  0x24   : > { %201 = vst [vmem:[%s1405_s10 + $0x80] sm:$0xff] %v200_v16  ;;  %203 = vst [vmem:[%s1405_s10 + $0x88] sm:$0xff] %v202_v17  ;;  %v206_v19 = vld [vmem:[%s1400_s9 + $0x118] sm:$0xff]  ;;  %v208_v20 = vld [vmem:[%s1400_s9 + $0x120] sm:$0xff] }
  0x25   : > { %205 = vst [vmem:[%s1405_s10 + $0x90] sm:$0xff] %v204_v18  ;;  %207 = vst [vmem:[%s1405_s10 + $0x98] sm:$0xff] %v206_v19  ;;  %v210_v21 = vld [vmem:[%s1400_s9 + $0x128] sm:$0xff]  ;;  %v212_v22 = vld [vmem:[%s1400_s9 + $0x130] sm:$0xff] }
  0x26   : > { %209 = vst [vmem:[%s1405_s10 + $0xa0] sm:$0xff] %v208_v20  ;;  %v214_v23 = vld [vmem:[%s1400_s9 + $0x138] sm:$0xff]  ;;  %211 = vst [vmem:[%s1405_s10 + $0xa8] sm:$0xff] %v210_v21  ;;  %v216_v24 = vld [vmem:[%s1400_s9 + $0x140] sm:$0xff] }
  0x27   : > { %213 = vst [vmem:[%s1405_s10 + $0xb0] sm:$0xff] %v212_v22  ;;  %215 = vst [vmem:[%s1405_s10 + $0xb8] sm:$0xff] %v214_v23  ;;  %v218_v25 = vld [vmem:[%s1400_s9 + $0x148] sm:$0xff]  ;;  %v220_v26 = vld [vmem:[%s1400_s9 + $0x150] sm:$0xff] }
  0x28   : > { %217 = vst [vmem:[%s1405_s10 + $0xc0] sm:$0xff] %v216_v24  ;;  %219 = vst [vmem:[%s1405_s10 + $0xc8] sm:$0xff] %v218_v25  ;;  %v222_v27 = vld [vmem:[%s1400_s9 + $0x158] sm:$0xff]  ;;  %v224_v28 = vld [vmem:[%s1400_s9 + $0x160] sm:$0xff] }
  0x29   : > { %221 = vst [vmem:[%s1405_s10 + $0xd0] sm:$0xff] %v220_v26  ;;  %v226_v29 = vld [vmem:[%s1400_s9 + $0x168] sm:$0xff]  ;;  %223 = vst [vmem:[%s1405_s10 + $0xd8] sm:$0xff] %v222_v27  ;;  %v228_v30 = vld [vmem:[%s1400_s9 + $0x170] sm:$0xff] }
  0x2a   : > { %225 = vst [vmem:[%s1405_s10 + $0xe0] sm:$0xff] %v224_v28  ;;  %227 = vst [vmem:[%s1405_s10 + $0xe8] sm:$0xff] %v226_v29  ;;  %v230_v31 = vld [vmem:[%s1400_s9 + $0x178] sm:$0xff] }
  0x2b   : > { %229 = vst [vmem:[%s1405_s10 + $0xf0] sm:$0xff] %v228_v30  ;;  %231 = vst [vmem:[%s1405_s10 + $0xf8] sm:$0xff] %v230_v31 }
  0x2c PF: > { %p1141_p9 = scmp.ge.s32.totalorder %s1311_s18, 1  ;;  %p236_p10 = scmp.lt.s32.totalorder %s1311_s18, 5 }
  0x2e   : > { %p237_p11 = pnand %p1141_p9, %p236_p10 }
  0x2f   : > { %s243_s11 = sand.u32 (!%p237_p11), 1, %s1287_s12   ;;  %v1313_v32 = vmov (!%p237_p11), 0.0   ;;  %v301_v33 = vld [vmem:[%s1729_s2] sm:$0xff] (!%p237_p11)  ;;  %v1314_v34 = vmov (!%p237_p11), 0   ;;  %v302_v38 = vld [vmem:[%s1729_s2 + $0x8] sm:$0xff] (!%p237_p11)  ;;  %vm313_vm0 = vcmask (!%p237_p11), 130048  }
  0x30   : > { %240 = sbr.rel (%p237_p11) target bundleno = 311 (0x137), region = 51  ;;  %s1471_s21 = sshll.u32 (!%p237_p11), %s243_s11, 8  ;;  %384 = vmatprep.mubr.f32.mxu0 (!%p237_p11), %v1313_v32  ;;  %461 = vmatprep.mubr.f32.mxu1 (!%p237_p11), %v1313_v32  ;;  %v1495_v47 = vld [vmem:[%s1728_s1] sm:$0xff] (!%p237_p11)  ;;  %v300_v3 = vld [vmem:[%s1728_s1 + $0x8] sm:$0xff] (!%p237_p11) }
  0x31   : > { %1256 = vset.pattern.permute.xlu0 (!%p237_p11), %v1314_v34  ;;  %s1479_s25 = scalar_lea.vmem (!%p237_p11), [#allocation2], %s1471_s21  ;;  %s1570_s5 = scalar_lea.vmem (!%p237_p11), [#allocation3], %s1471_s21 }
  0x32   : > { %v268_v35 = vld [vmem:[%s1479_s25 + $0x8] sm:$0xff] (!%p237_p11)  ;;  %v270_v37 = vld [vmem:[%s1479_s25 + $0x18] sm:$0xff] (!%p237_p11)  ;;  %305 = vperm.xlu0 (!%p237_p11), %1256, %v301_v33   ;;  %v267_v41 = vld [vmem:[%s1479_s25] sm:$0xff] (!%p237_p11) }
  0x33   : > { %v284_v36 = vld [vmem:[%s1479_s25 + $0x88] sm:$0xff] (!%p237_p11)  ;;  %v286_v40 = vld [vmem:[%s1479_s25 + $0x98] sm:$0xff] (!%p237_p11)  ;;  %v283_v42 = vld [vmem:[%s1479_s25 + $0x80] sm:$0xff] (!%p237_p11) }
  0x34   : > { %v1166_v39 = vpack.c.bf16 (!%p237_p11), %v284_v36, %v268_v35  ;;  %v1170_v43 = vpack.c.bf16 (!%p237_p11), %v286_v40, %v270_v37  ;;  %v1168_v44 = vpack.c.bf16 (!%p237_p11), %v283_v42, %v267_v41  ;;  %v269_v45 = vld [vmem:[%s1479_s25 + $0x10] sm:$0xff] (!%p237_p11)  ;;  %v272_v48 = vld [vmem:[%s1479_s25 + $0x28] sm:$0xff] (!%p237_p11)  ;;  %v274_v51 = vld [vmem:[%s1479_s25 + $0x38] sm:$0xff] (!%p237_p11) }
  0x35   : > { %v285_v46 = vld [vmem:[%s1479_s25 + $0x90] sm:$0xff] (!%p237_p11)  ;;  %v288_v50 = vld [vmem:[%s1479_s25 + $0xa8] sm:$0xff] (!%p237_p11)  ;;  %v290_v52 = vld [vmem:[%s1479_s25 + $0xb8] sm:$0xff] (!%p237_p11) }
  0x36   : > { %1167 = vmatprep.subr.bf16.mxu0 (!%p237_p11), %v1166_v39  ;;  %v1172_v49 = vpack.c.bf16 (!%p237_p11), %v285_v46, %v269_v45  ;;  %1171 = vmatprep.subr.bf16.mxu1 (!%p237_p11), %v1170_v43  ;;  %v1174_v53 = vpack.c.bf16 (!%p237_p11), %v288_v50, %v272_v48  ;;  %v1178_v54 = vpack.c.bf16 (!%p237_p11), %v290_v52, %v274_v51  ;;  %v271_v55 = vld [vmem:[%s1479_s25 + $0x20] sm:$0xff] (!%p237_p11)  ;;  %v273_v57 = vld [vmem:[%s1479_s25 + $0x30] sm:$0xff] (!%p237_p11)  ;;  %v276_v60 = vld [vmem:[%s1479_s25 + $0x48] sm:$0xff] (!%p237_p11) }
  0x37   : > { %1169 = vmatpush1.bf16.msra.mxu0 %v1168_v44  ;;  %v287_v56 = vld [vmem:[%s1479_s25 + $0xa0] sm:$0xff]  ;;  %v289_v59 = vld [vmem:[%s1479_s25 + $0xb0] sm:$0xff]  ;;  %v292_v61 = vld [vmem:[%s1479_s25 + $0xc8] sm:$0xff]  ;;  %310 = vperm.xlu0 %1256, %v302_v38   ;;  %s1161_s6 = sshll.u32 (%p1383_p6), %s1295_s14, 4  ;;  %s1162_s7 = sshll.u32 (%p1383_p6), %s1299_s15, 6 }
  0x38   : > { %1173 = vmatpush1.bf16.msra.mxu1 %v1172_v49  ;;  %v1176_v58 = vpack.c.bf16 %v287_v56, %v271_v55  ;;  %1175 = vmatprep.subr.bf16.mxu0 %v1174_v53  ;;  %v1180_v62 = vpack.c.bf16 %v289_v59, %v273_v57  ;;  %v1182_v63 = vpack.c.bf16 %v292_v61, %v276_v60  ;;  %v278_v0 = vld [vmem:[%s1479_s25 + $0x58] sm:$0xff]  ;;  %v275_v4 = vld [vmem:[%s1479_s25 + $0x40] sm:$0xff]  ;;  %v277_v6 = vld [vmem:[%s1479_s25 + $0x50] sm:$0xff]  ;;  %s977_s23 = sadd.s32 (%p1383_p6), %s1162_s7, %s1161_s6 }
  0x39   : > { %1179 = vmatprep.subr.bf16.mxu1 %v1178_v54  ;;  %v294_v1 = vld [vmem:[%s1479_s25 + $0xd8] sm:$0xff]  ;;  %v291_v5 = vld [vmem:[%s1479_s25 + $0xc0] sm:$0xff]  ;;  %v293_v7 = vld [vmem:[%s1479_s25 + $0xd0] sm:$0xff]  ;;  %s1163_s8 = sshll.u32 (%p1383_p6), %s977_s23, 3 }
  0x3a   : > { %1144 = vmatmul.mubr.msk.f32.vlgmr.msra.gmra.mrb[0].mxu0 %vm313_vm0, %v1495_v47  ;;  %v1186_v2 = vpack.c.bf16 %v294_v1, %v278_v0  ;;  %v280_v8 = vld [vmem:[%s1479_s25 + $0x68] sm:$0xff]  ;;  %v1184_v10 = vpack.c.bf16 %v291_v5, %v275_v4  ;;  %v282_v11 = vld [vmem:[%s1479_s25 + $0x78] sm:$0xff]  ;;  %v1188_v13 = vpack.c.bf16 %v293_v7, %v277_v6  ;;  %v279_v16 = vld [vmem:[%s1479_s25 + $0x60] sm:$0xff]  ;;  %s1649_s11 = scalar_lea.vmem (%p1383_p6), %s1730_s3, %s1163_s8 }
  0x3b   : > { %1146 = vmatmul.mubr.msk.f32.vlgmr.msra.gmra.mrb[0].mxu1 %vm313_vm0, %v1495_v47  ;;  %1177 = vmatpush1.bf16.msra.mxu0 %v1176_v58  ;;  %v296_v9 = vld [vmem:[%s1479_s25 + $0xe8] sm:$0xff]  ;;  %v298_v12 = vld [vmem:[%s1479_s25 + $0xf8] sm:$0xff]  ;;  %v295_v17 = vld [vmem:[%s1479_s25 + $0xe0] sm:$0xff] }
  0x3c   : > { %1181 = vmatpush1.bf16.msra.mxu1 %v1180_v62  ;;  %390 = vmatprep.mubr.f32.mxu0 %v1313_v32  ;;  %v1190_v14 = vpack.c.bf16 %v296_v9, %v280_v8  ;;  %v1194_v15 = vpack.c.bf16 %v298_v12, %v282_v11  ;;  %v281_v18 = vld [vmem:[%s1479_s25 + $0x70] sm:$0xff]  ;;  %v1192_v20 = vpack.c.bf16 %v295_v17, %v279_v16 }
  0x3d   : > { %467 = vmatprep.mubr.f32.mxu1 %v1313_v32  ;;  %1183 = vmatprep.subr.bf16.mxu0 %v1182_v63  ;;  %v297_v19 = vld [vmem:[%s1479_s25 + $0xf0] sm:$0xff] }
  0x3e   : > { %1145 = vmatmul.mubr.msk.f32.gmra.mrb[2].mxu0 %vm313_vm0, %v300_v3  ;;  %1187 = vmatprep.subr.bf16.mxu1 %v1186_v2  ;;  %v1196_v21 = vpack.c.bf16 %v297_v19, %v281_v18 }
  0x3f   : > { %1147 = vmatmul.mubr.msk.f32.gmra.mrb[2].mxu1 %vm313_vm0, %v300_v3  ;;  %538 = vmatprep.mubr.f32.mxu0 %v1313_v32 }
  0x40   : > { %615 = vmatprep.mubr.f32.mxu1 %v1313_v32 }
  0x42   : > { %1148 = vmatmul.mubr.msk.f32.vlgmr.msra.gmra.mrb[4].mxu0 %vm313_vm0, %v1495_v47 }
  0x43   : > { %1150 = vmatmul.mubr.msk.f32.vlgmr.msra.gmra.mrb[4].mxu1 %vm313_vm0, %v1495_v47  ;;  %1185 = vmatpush1.bf16.msra.mxu0 %v1184_v10 }
  0x44   : > { %1189 = vmatpush1.bf16.msra.mxu1 %v1188_v13  ;;  %544 = vmatprep.mubr.f32.mxu0 %v1313_v32 }
  0x45   : > { %621 = vmatprep.mubr.f32.mxu1 %v1313_v32  ;;  %1191 = vmatprep.subr.bf16.mxu0 %v1190_v14 }
  0x46   : > { %1149 = vmatmul.mubr.msk.f32.gmra.mrb[6].mxu0 %vm313_vm0, %v300_v3  ;;  %1195 = vmatprep.subr.bf16.mxu1 %v1194_v15 }
  0x47   : > { %1151 = vmatmul.mubr.msk.f32.gmra.mrb[6].mxu1 %vm313_vm0, %v300_v3  ;;  %692 = vmatprep.mubr.f32.mxu0 %v1313_v32 }
  0x48   : > { %769 = vmatprep.mubr.f32.mxu1 %v1313_v32 }
  0x4a   : > { %1152 = vmatmul.mubr.msk.f32.vlgmr.msra.gmra.mrb[8].mxu0 %vm313_vm0, %v1495_v47 }
  0x4b   : > { %1154 = vmatmul.mubr.msk.f32.vlgmr.msra.gmra.mrb[8].mxu1 %vm313_vm0, %v1495_v47  ;;  %1193 = vmatpush1.bf16.msra.mxu0 %v1192_v20 }
  0x4c   : > { %1197 = vmatpush1.bf16.msra.mxu1 %v1196_v21  ;;  %698 = vmatprep.mubr.f32.mxu0 %v1313_v32 }
  0x4d   : > { %775 = vmatprep.mubr.f32.mxu1 %v1313_v32 }
  0x4e   : > { %1153 = vmatmul.mubr.msk.f32.gmra.mrb[10].mxu0 %vm313_vm0, %v300_v3 }
  0x4f   : > { %1155 = vmatmul.mubr.msk.f32.gmra.mrb[10].mxu1 %vm313_vm0, %v300_v3  ;;  %846 = vmatprep.mubr.f32.mxu0 %v1313_v32 }
  0x50   : > { %923 = vmatprep.mubr.f32.mxu1 %v1313_v32 }
  0x52   : > { %1156 = vmatmul.mubr.msk.f32.vlgmr.msra.gmra.mrb[12].mxu0 %vm313_vm0, %v1495_v47 }
  0x53   : > { %1158 = vmatmul.mubr.msk.f32.vlgmr.msra.gmra.mrb[12].mxu1 %vm313_vm0, %v1495_v47  ;;  %852 = vmatprep.mubr.f32.mxu0 %v1313_v32 }
  0x54   : > { %929 = vmatprep.mubr.f32.mxu1 %v1313_v32 }
  0x56   : > { %1157 = vmatmul.mubr.msk.f32.gmra.mrb[14].mxu0 %vm313_vm0, %v300_v3 }
  0x57   : > { %1159 = vmatmul.mubr.msk.f32.gmra.mrb[14].mxu1 %vm313_vm0, %v300_v3 }
  0xb1   : > { %v1562_v22 = vpop.permute.xlu0 %305 }
  0xb6   : > { %v1567_v30 = vpop.permute.xlu0 %310 }
 0x10d   : > { %v386_v23 = vpop.f32.mrb[0].mxu0 }
 0x10e   : > { %v463_v24 = vpop.f32.mrb[0].mxu1  ;;  %v387_v25 = vadd.f32 %v386_v23, %v1562_v22  ;;  %v388_v26 = vpop.f32.mrb[1].mxu0 }
 0x10f   : > { %v464_v27 = vadd.f32 %v463_v24, %v1562_v22  ;;  %v389_v28 = vadd.f32 %v388_v26, %v1562_v22  ;;  %v465_v29 = vpop.f32.mrb[1].mxu1 }
 0x110   : > { %936 = vst [vmem:[%s1570_s5] sm:$0xff] %v387_v25  ;;  %v466_v31 = vadd.f32 %v465_v29, %v1562_v22 }
 0x111   : > { %938 = vst [vmem:[%s1570_s5 + $0x10] sm:$0xff] %v464_v27  ;;  %937 = vst [vmem:[%s1570_s5 + $0x8] sm:$0xff] %v389_v28  ;;  %v392_v32 = vpop.f32.mrb[2].mxu0 }
 0x112   : > { %939 = vst [vmem:[%s1570_s5 + $0x18] sm:$0xff] %v466_v31  ;;  %v469_v33 = vpop.f32.mrb[2].mxu1  ;;  %v393_v34 = vadd.f32 %v392_v32, %v1567_v30  ;;  %v394_v35 = vpop.f32.mrb[3].mxu0 }
 0x113   : > { %v470_v36 = vadd.f32 %v469_v33, %v1567_v30  ;;  %v395_v37 = vadd.f32 %v394_v35, %v1567_v30  ;;  %v471_v38 = vpop.f32.mrb[3].mxu1 }
 0x114   : > { %952 = vst [vmem:[%s1570_s5 + $0x80] sm:$0xff] %v393_v34  ;;  %v472_v39 = vadd.f32 %v471_v38, %v1567_v30 }
 0x115   : > { %954 = vst [vmem:[%s1570_s5 + $0x90] sm:$0xff] %v470_v36  ;;  %953 = vst [vmem:[%s1570_s5 + $0x88] sm:$0xff] %v395_v37  ;;  %v540_v40 = vpop.f32.mrb[4].mxu0 }
 0x116   : > { %955 = vst [vmem:[%s1570_s5 + $0x98] sm:$0xff] %v472_v39  ;;  %v541_v41 = vadd.f32 %v540_v40, %v1562_v22  ;;  %v617_v42 = vpop.f32.mrb[4].mxu1  ;;  %v542_v43 = vpop.f32.mrb[5].mxu0 }
 0x117   : > { %v618_v44 = vadd.f32 %v617_v42, %v1562_v22  ;;  %v543_v45 = vadd.f32 %v542_v43, %v1562_v22  ;;  %v619_v46 = vpop.f32.mrb[5].mxu1 }
 0x118   : > { %940 = vst [vmem:[%s1570_s5 + $0x20] sm:$0xff] %v541_v41  ;;  %v620_v47 = vadd.f32 %v619_v46, %v1562_v22  ;;  %v994_v25 = vld [vmem:[%s1570_s5 + $0x8] sm:$0xff] (%p1383_p6)  ;;  %v996_v26 = vld [vmem:[%s1570_s5 + $0x10] sm:$0xff] (%p1383_p6) }
 0x119   : > { %942 = vst [vmem:[%s1570_s5 + $0x30] sm:$0xff] %v618_v44  ;;  %941 = vst [vmem:[%s1570_s5 + $0x28] sm:$0xff] %v543_v45  ;;  %v546_v48 = vpop.f32.mrb[6].mxu0  ;;  %v998_v27 = vld [vmem:[%s1570_s5 + $0x18] sm:$0xff] (%p1383_p6) }
 0x11a   : > { %943 = vst [vmem:[%s1570_s5 + $0x38] sm:$0xff] %v620_v47  ;;  %v547_v49 = vadd.f32 %v546_v48, %v1567_v30  ;;  %v623_v50 = vpop.f32.mrb[6].mxu1  ;;  %v548_v51 = vpop.f32.mrb[7].mxu0  ;;  %995 = vst [vmem:[%s1649_s11 + $0x8] sm:$0xff] (%p1383_p6), %v994_v25 }
 0x11b   : > { %v624_v52 = vadd.f32 %v623_v50, %v1567_v30  ;;  %v549_v53 = vadd.f32 %v548_v51, %v1567_v30  ;;  %v625_v54 = vpop.f32.mrb[7].mxu1  ;;  %997 = vst [vmem:[%s1649_s11 + $0x10] sm:$0xff] (%p1383_p6), %v996_v26  ;;  %999 = vst [vmem:[%s1649_s11 + $0x18] sm:$0xff] (%p1383_p6), %v998_v27  ;;  %v1024_v40 = vld [vmem:[%s1570_s5 + $0x80] sm:$0xff] (%p1383_p6) }
 0x11c   : > { %956 = vst [vmem:[%s1570_s5 + $0xa0] sm:$0xff] %v547_v49  ;;  %v626_v55 = vadd.f32 %v625_v54, %v1567_v30  ;;  %v1026_v41 = vld [vmem:[%s1570_s5 + $0x88] sm:$0xff] (%p1383_p6)  ;;  %1025 = vst [vmem:[%s1649_s11 + $0x100] sm:$0xff] (%p1383_p6), %v1024_v40  ;;  %v1028_v42 = vld [vmem:[%s1570_s5 + $0x90] sm:$0xff] (%p1383_p6) }
 0x11d   : > { %958 = vst [vmem:[%s1570_s5 + $0xb0] sm:$0xff] %v624_v52  ;;  %957 = vst [vmem:[%s1570_s5 + $0xa8] sm:$0xff] %v549_v53  ;;  %v694_v56 = vpop.f32.mrb[8].mxu0  ;;  %v1030_v43 = vld [vmem:[%s1570_s5 + $0x98] sm:$0xff] (%p1383_p6) }
 0x11e   : > { %959 = vst [vmem:[%s1570_s5 + $0xb8] sm:$0xff] %v626_v55  ;;  %v695_v57 = vadd.f32 %v694_v56, %v1562_v22  ;;  %v771_v58 = vpop.f32.mrb[8].mxu1  ;;  %v696_v59 = vpop.f32.mrb[9].mxu0  ;;  %1027 = vst [vmem:[%s1649_s11 + $0x108] sm:$0xff] (%p1383_p6), %v1026_v41 }
 0x11f   : > { %v772_v60 = vadd.f32 %v771_v58, %v1562_v22  ;;  %v697_v61 = vadd.f32 %v696_v59, %v1562_v22  ;;  %v773_v62 = vpop.f32.mrb[9].mxu1  ;;  %v1000_v28 = vld [vmem:[%s1570_s5 + $0x20] sm:$0xff] (%p1383_p6)  ;;  %1029 = vst [vmem:[%s1649_s11 + $0x110] sm:$0xff] (%p1383_p6), %v1028_v42  ;;  %1031 = vst [vmem:[%s1649_s11 + $0x118] sm:$0xff] (%p1383_p6), %v1030_v43 }
 0x120   : > { %944 = vst [vmem:[%s1570_s5 + $0x40] sm:$0xff] %v695_v57  ;;  %v774_v63 = vadd.f32 %v773_v62, %v1562_v22  ;;  %v1002_v29 = vld [vmem:[%s1570_s5 + $0x28] sm:$0xff] (%p1383_p6)  ;;  %1001 = vst [vmem:[%s1649_s11 + $0x20] sm:$0xff] (%p1383_p6), %v1000_v28 }
 0x121   : > { %946 = vst [vmem:[%s1570_s5 + $0x50] sm:$0xff] %v772_v60  ;;  %945 = vst [vmem:[%s1570_s5 + $0x48] sm:$0xff] %v697_v61  ;;  %v700_v0 = vpop.f32.mrb[10].mxu0  ;;  %v1006_v31 = vld [vmem:[%s1570_s5 + $0x38] sm:$0xff] (%p1383_p6) }
 0x122   : > { %947 = vst [vmem:[%s1570_s5 + $0x58] sm:$0xff] %v774_v63  ;;  %v701_v1 = vadd.f32 %v700_v0, %v1567_v30  ;;  %v777_v2 = vpop.f32.mrb[10].mxu1  ;;  %v702_v3 = vpop.f32.mrb[11].mxu0  ;;  %1003 = vst [vmem:[%s1649_s11 + $0x28] sm:$0xff] (%p1383_p6), %v1002_v29 }
 0x123   : > { %v778_v4 = vadd.f32 %v777_v2, %v1567_v30  ;;  %v703_v5 = vadd.f32 %v702_v3, %v1567_v30  ;;  %v779_v6 = vpop.f32.mrb[11].mxu1  ;;  %1007 = vst [vmem:[%s1649_s11 + $0x38] sm:$0xff] (%p1383_p6), %v1006_v31  ;;  %v1032_v44 = vld [vmem:[%s1570_s5 + $0xa0] sm:$0xff] (%p1383_p6) }
 0x124   : > { %960 = vst [vmem:[%s1570_s5 + $0xc0] sm:$0xff] %v701_v1  ;;  %v780_v7 = vadd.f32 %v779_v6, %v1567_v30  ;;  %1033 = vst [vmem:[%s1649_s11 + $0x120] sm:$0xff] (%p1383_p6), %v1032_v44  ;;  %v1034_v45 = vld [vmem:[%s1570_s5 + $0xa8] sm:$0xff] (%p1383_p6)  ;;  %v1036_v46 = vld [vmem:[%s1570_s5 + $0xb0] sm:$0xff] (%p1383_p6) }
 0x125   : > { %962 = vst [vmem:[%s1570_s5 + $0xd0] sm:$0xff] %v778_v4  ;;  %961 = vst [vmem:[%s1570_s5 + $0xc8] sm:$0xff] %v703_v5  ;;  %v848_v8 = vpop.f32.mrb[12].mxu0  ;;  %v1038_v47 = vld [vmem:[%s1570_s5 + $0xb8] sm:$0xff] (%p1383_p6) }
 0x126   : > { %963 = vst [vmem:[%s1570_s5 + $0xd8] sm:$0xff] %v780_v7  ;;  %v849_v9 = vadd.f32 %v848_v8, %v1562_v22  ;;  %v925_v10 = vpop.f32.mrb[12].mxu1  ;;  %v850_v11 = vpop.f32.mrb[13].mxu0  ;;  %1035 = vst [vmem:[%s1649_s11 + $0x128] sm:$0xff] (%p1383_p6), %v1034_v45 }
 0x127   : > { %v926_v12 = vadd.f32 %v925_v10, %v1562_v22  ;;  %v851_v13 = vadd.f32 %v850_v11, %v1562_v22  ;;  %v927_v14 = vpop.f32.mrb[13].mxu1  ;;  %v1008_v32 = vld [vmem:[%s1570_s5 + $0x40] sm:$0xff] (%p1383_p6)  ;;  %1037 = vst [vmem:[%s1649_s11 + $0x130] sm:$0xff] (%p1383_p6), %v1036_v46  ;;  %1039 = vst [vmem:[%s1649_s11 + $0x138] sm:$0xff] (%p1383_p6), %v1038_v47 }
 0x128   : > { %948 = vst [vmem:[%s1570_s5 + $0x60] sm:$0xff] %v849_v9  ;;  %v928_v15 = vadd.f32 %v927_v14, %v1562_v22  ;;  %974 = sbr.rel (!%p1383_p6) target bundleno = 311 (0x137), region = 59  ;;  %v992_v22 = vld [vmem:[%s1570_s5] sm:$0xff] (%p1383_p6)  ;;  %v1010_v33 = vld [vmem:[%s1570_s5 + $0x48] sm:$0xff] (%p1383_p6)  ;;  %v1012_v34 = vld [vmem:[%s1570_s5 + $0x50] sm:$0xff] (%p1383_p6) }
 0x129   : > { %950 = vst [vmem:[%s1570_s5 + $0x70] sm:$0xff] %v926_v12  ;;  %949 = vst [vmem:[%s1570_s5 + $0x68] sm:$0xff] %v851_v13  ;;  %v854_v16 = vpop.f32.mrb[14].mxu0  ;;  %v1014_v35 = vld [vmem:[%s1570_s5 + $0x58] sm:$0xff] (%p1383_p6) }
 0x12a   : > { %951 = vst [vmem:[%s1570_s5 + $0x78] sm:$0xff] %v928_v15  ;;  %v855_v17 = vadd.f32 %v854_v16, %v1567_v30  ;;  %v931_v18 = vpop.f32.mrb[14].mxu1  ;;  %v856_v19 = vpop.f32.mrb[15].mxu0  ;;  %993 = vst [vmem:[%s1649_s11] sm:$0xff] (%p1383_p6), %v992_v22 }
 0x12b   : > { %v932_v20 = vadd.f32 %v931_v18, %v1567_v30  ;;  %v857_v21 = vadd.f32 %v856_v19, %v1567_v30  ;;  %v933_v23 = vpop.f32.mrb[15].mxu1  ;;  %1009 = vst [vmem:[%s1649_s11 + $0x40] sm:$0xff] (%p1383_p6), %v1008_v32  ;;  %1011 = vst [vmem:[%s1649_s11 + $0x48] sm:$0xff] (%p1383_p6), %v1010_v33  ;;  %v1040_v48 = vld [vmem:[%s1570_s5 + $0xc0] sm:$0xff] (%p1383_p6) }
 0x12c   : > { %964 = vst [vmem:[%s1570_s5 + $0xe0] sm:$0xff] %v855_v17  ;;  %v934_v24 = vadd.f32 %v933_v23, %v1567_v30  ;;  %v1004_v30 = vld [vmem:[%s1570_s5 + $0x30] sm:$0xff] (%p1383_p6)  ;;  %1013 = vst [vmem:[%s1649_s11 + $0x50] sm:$0xff] (%p1383_p6), %v1012_v34  ;;  %v1042_v49 = vld [vmem:[%s1570_s5 + $0xc8] sm:$0xff] (%p1383_p6) }
 0x12d   : > { %966 = vst [vmem:[%s1570_s5 + $0xf0] sm:$0xff] %v932_v20  ;;  %965 = vst [vmem:[%s1570_s5 + $0xe8] sm:$0xff] %v857_v21  ;;  %v1044_v50 = vld [vmem:[%s1570_s5 + $0xd0] sm:$0xff] (%p1383_p6)  ;;  %v1046_v51 = vld [vmem:[%s1570_s5 + $0xd8] sm:$0xff] (%p1383_p6) }
 0x12e   : > { %967 = vst [vmem:[%s1570_s5 + $0xf8] sm:$0xff] %v934_v24  ;;  %1005 = vst [vmem:[%s1649_s11 + $0x30] sm:$0xff] (%p1383_p6), %v1004_v30 }
 0x12f   : > { %1015 = vst [vmem:[%s1649_s11 + $0x58] sm:$0xff] %v1014_v35  ;;  %v1016_v36 = vld [vmem:[%s1570_s5 + $0x60] sm:$0xff]  ;;  %1041 = vst [vmem:[%s1649_s11 + $0x140] sm:$0xff] %v1040_v48 }
 0x130   : > { %v1018_v37 = vld [vmem:[%s1570_s5 + $0x68] sm:$0xff]  ;;  %v1020_v38 = vld [vmem:[%s1570_s5 + $0x70] sm:$0xff]  ;;  %1017 = vst [vmem:[%s1649_s11 + $0x60] sm:$0xff] %v1016_v36  ;;  %1043 = vst [vmem:[%s1649_s11 + $0x148] sm:$0xff] %v1042_v49 }
 0x131   : > { %1019 = vst [vmem:[%s1649_s11 + $0x68] sm:$0xff] %v1018_v37  ;;  %1021 = vst [vmem:[%s1649_s11 + $0x70] sm:$0xff] %v1020_v38  ;;  %v1022_v39 = vld [vmem:[%s1570_s5 + $0x78] sm:$0xff] }
 0x132   : > { %1023 = vst [vmem:[%s1649_s11 + $0x78] sm:$0xff] %v1022_v39  ;;  %1045 = vst [vmem:[%s1649_s11 + $0x150] sm:$0xff] %v1044_v50 }
 0x133   : > { %v1048_v52 = vld [vmem:[%s1570_s5 + $0xe0] sm:$0xff]  ;;  %1047 = vst [vmem:[%s1649_s11 + $0x158] sm:$0xff] %v1046_v51 }
 0x134   : > { %v1050_v53 = vld [vmem:[%s1570_s5 + $0xe8] sm:$0xff]  ;;  %1049 = vst [vmem:[%s1649_s11 + $0x160] sm:$0xff] %v1048_v52  ;;  %v1052_v54 = vld [vmem:[%s1570_s5 + $0xf0] sm:$0xff] }
 0x135   : > { %1051 = vst [vmem:[%s1649_s11 + $0x168] sm:$0xff] %v1050_v53  ;;  %v1054_v55 = vld [vmem:[%s1570_s5 + $0xf8] sm:$0xff]  ;;  %1053 = vst [vmem:[%s1649_s11 + $0x170] sm:$0xff] %v1052_v54 }
 0x136   : > { %1055 = vst [vmem:[%s1649_s11 + $0x178] sm:$0xff] %v1054_v55 }
 0x137 PF: > { %s13_s18 = sadd.s32 1, %s1311_s18   ;;  %s1732_s12 = smov %s1291_s13 }
 0x138   : > { %p10_p12 = scmp.ge.s32.totalorder %s13_s18, 6   ;;  %s1733_s13 = smov %s1391_s27 }
 0x139   : > { %s1734_s14 = smov %s1303_s16  ;;  %s1735_s15 = smov %s1307_s17 }
 0x13a   : > { %s1736_s16 = smov %s1739_s19  ;;  %s1737_s17 = smov %s1743_s20 }
 0x13b   :  { %12 = sbr.rel (!%p10_p12) target bundleno = 4 (0x4), region = 113 }

</bundles_post_ra>
